<compile_context>
chip_gen: v5e
topology: v5e:2x2
jax: 0.10.0
libtpu: 0.0.40
codegen_flags: <defaults>
</compile_context>

<pallas_src>
import numpy as np
import jax
import jax.numpy as jnp
from jax.experimental import pallas as pl
from jax.experimental.pallas import tpu as pltpu

_LANE = 128  # TPU lane width; output feature dim is padded to this.


def _round_up(x, m):
    return ((x + m - 1) // m) * m


def _policy_kernel(obs_ref, w1_ref, b1_ref, w2_ref, b2_ref, wm_ref, bm_ref,
                   mean_ref):
    """One batch tile of the MLP forward. Weights are VMEM-resident."""
    x = obs_ref[...]
    # linear1 + ReLU
    h1 = jnp.dot(x, w1_ref[...], preferred_element_type=jnp.float32) + b1_ref[...]
    h1 = jnp.maximum(h1, 0.0)
    # linear2 + ReLU
    h2 = jnp.dot(h1, w2_ref[...], preferred_element_type=jnp.float32) + b2_ref[...]
    h2 = jnp.maximum(h2, 0.0)
    # mean head (lane-dense padded width); pad columns of Wm/bm are zero.
    mean = jnp.dot(h2, wm_ref[...], preferred_element_type=jnp.float32) + bm_ref[...]
    mean_ref[...] = mean.astype(mean_ref.dtype)


def gaussian_policy_forward(obs, params):
    """obs: (B, num_inputs) float32. params: dict of weights/biases.

    Returns (mean, log_std), each (B, num_actions), matching
    GaussianPolicy.forward (log_std is the constant -2).
    """
    obs = obs.astype(jnp.float32)
    w1, b1 = params["w1"], params["b1"]
    w2, b2 = params["w2"], params["b2"]
    wm, bm = params["wm"], params["bm"]

    B, F = obs.shape
    H = w1.shape[1]
    A = wm.shape[1]
    A_pad = _round_up(A, _LANE)

    # Zero-pad the mean head once so the kernel's output store is lane-dense.
    wm_p = jnp.pad(wm, ((0, 0), (0, A_pad - A)))
    bm_p = jnp.pad(bm, ((0, 0), (0, A_pad - A)))

    # Batch tile: multiple of 8 sublanes, capped at 512 rows so double-buffered
    # obs/mean tiles fit comfortably inside scoped VMEM on v5e/v6e/v7x.
    TB = max(8, min(512, _round_up(B, 8)))
    grid = (pl.cdiv(B, TB),)

    resident = lambda shape: pl.BlockSpec(shape, lambda i: (0, 0))

    mean_pad = pl.pallas_call(
        _policy_kernel,
        out_shape=jax.ShapeDtypeStruct((B, A_pad), jnp.float32),
        grid=grid,
        in_specs=[
            pl.BlockSpec((TB, F), lambda i: (i, 0)),   # obs: streams over batch
            resident((F, H)),                          # w1 (VMEM-resident)
            resident((1, H)),                          # b1
            resident((H, H)),                          # w2
            resident((1, H)),                          # b2
            resident((H, A_pad)),                      # wm (lane-padded)
            resident((1, A_pad)),                      # bm (lane-padded)
        ],
        out_specs=pl.BlockSpec((TB, A_pad), lambda i: (i, 0)),
        compiler_params=pltpu.CompilerParams(
            dimension_semantics=("parallel",),
        ),
    )(obs, w1, b1, w2, b2, wm_p, bm_p)

    mean = mean_pad[:, :A]
    # log_std = ones_like(mean) * -2 is a constant: no kernel work needed.
    log_std = jnp.full((B, A), -2.0, jnp.float32)
    return mean, log_std


def _xavier_uniform(key, fan_in, fan_out):
    # torch.nn.init.xavier_uniform_ with gain=1 on a Linear weight (out, in);
    # we store the transpose (in, out); the bound is symmetric in fan_in/out.
    bound = float(np.sqrt(6.0 / (fan_in + fan_out)))
    return jax.random.uniform(key, (fan_in, fan_out), jnp.float32, -bound, bound)


def init_params(key, num_inputs, hidden_dim, num_actions):
    k1, k2, k3 = jax.random.split(key, 3)
    return {
        "w1": _xavier_uniform(k1, num_inputs, hidden_dim),
        "b1": jnp.zeros((1, hidden_dim), jnp.float32),
        "w2": _xavier_uniform(k2, hidden_dim, hidden_dim),
        "b2": jnp.zeros((1, hidden_dim), jnp.float32),
        "wm": _xavier_uniform(k3, hidden_dim, num_actions),
        "bm": jnp.zeros((1, num_actions), jnp.float32),
        # log_std_linear exists in __init__ but is not used in forward().
    }


if __name__ == "__main__":
    # Small shapes: batch=8, flattened obs dim=16, hidden=32, actions=4.
    B, NUM_INPUTS, HIDDEN, NUM_ACTIONS = 8, 16, 32, 4

    key = jax.random.PRNGKey(0)
    k_obs, k_params = jax.random.split(key)

    obs = jax.random.normal(k_obs, (B, NUM_INPUTS), jnp.float32)
    params = init_params(k_params, NUM_INPUTS, HIDDEN, NUM_ACTIONS)

    mean, log_std = gaussian_policy_forward(obs, params)
    jax.block_until_ready((mean, log_std))

    # Reference check in plain JAX (same math as the PyTorch forward).
    h1 = jnp.maximum(obs @ params["w1"] + params["b1"], 0.0)
    h2 = jnp.maximum(h1 @ params["w2"] + params["b2"], 0.0)
    mean_ref = h2 @ params["wm"] + params["bm"]
    log_std_ref = jnp.full_like(mean_ref, -2.0)

    assert mean.shape == (B, NUM_ACTIONS) and log_std.shape == (B, NUM_ACTIONS)
    np.testing.assert_allclose(np.asarray(mean), np.asarray(mean_ref),
                               rtol=1e-5, atol=1e-5)
    np.testing.assert_allclose(np.asarray(log_std), np.asarray(log_std_ref),
                               rtol=0, atol=0)

    print("KERNEL_OK")
</pallas_src>

<mosaic_0001>
module attributes {stable_mosaic.version = 11 : i64} {
  func.func @_policy_kernel(%arg0: i32, %arg1: memref<8x16xf32, #tpu.memory_space<vmem>>, %arg2: memref<16x32xf32, #tpu.memory_space<vmem>>, %arg3: memref<1x32xf32, #tpu.memory_space<vmem>>, %arg4: memref<32x32xf32, #tpu.memory_space<vmem>>, %arg5: memref<1x32xf32, #tpu.memory_space<vmem>>, %arg6: memref<32x128xf32, #tpu.memory_space<vmem>>, %arg7: memref<1x128xf32, #tpu.memory_space<vmem>>, %arg8: memref<8x128xf32, #tpu.memory_space<vmem>>) attributes {dimension_semantics = [#tpu.dimension_semantics<parallel>], iteration_bounds = array<i64: 1>, scalar_prefetch = 0 : i64, scratch_operands = 0 : i64, tpu.core_type = #tpu.core_type<tc>, window_params = [{transform_indices = @transform_0, window_bounds = array<i64: 8, 16>}, {pipeline_mode = #tpu.pipeline_mode<synchronous>, transform_indices = @transform_1, window_bounds = array<i64: 16, 32>}, {pipeline_mode = #tpu.pipeline_mode<synchronous>, transform_indices = @transform_2, window_bounds = array<i64: 1, 32>}, {pipeline_mode = #tpu.pipeline_mode<synchronous>, transform_indices = @transform_3, window_bounds = array<i64: 32, 32>}, {pipeline_mode = #tpu.pipeline_mode<synchronous>, transform_indices = @transform_4, window_bounds = array<i64: 1, 32>}, {pipeline_mode = #tpu.pipeline_mode<synchronous>, transform_indices = @transform_5, window_bounds = array<i64: 32, 128>}, {pipeline_mode = #tpu.pipeline_mode<synchronous>, transform_indices = @transform_6, window_bounds = array<i64: 1, 128>}, {transform_indices = @transform_7, window_bounds = array<i64: 8, 128>}]} {
    %c0 = arith.constant 0 : index
    %c0_0 = arith.constant 0 : index
    %0 = vector.load %arg1[%c0, %c0_0] : memref<8x16xf32, #tpu.memory_space<vmem>>, vector<8x16xf32>
    %c0_1 = arith.constant 0 : index
    %c0_2 = arith.constant 0 : index
    %1 = vector.load %arg2[%c0_1, %c0_2] : memref<16x32xf32, #tpu.memory_space<vmem>>, vector<16x32xf32>
    %cst = arith.constant dense<0.000000e+00> : vector<8x32xf32>
    %2 = tpu.matmul %0, %1, %cst {dimension_numbers = #tpu.dot_dimension_numbers<[1], [0], [0], [1], [0, 0, 1, 1], [], []>} : vector<8x16xf32>, vector<16x32xf32>, vector<8x32xf32> -> vector<8x32xf32>
    %c0_3 = arith.constant 0 : index
    %c0_4 = arith.constant 0 : index
    %3 = vector.load %arg3[%c0_3, %c0_4] : memref<1x32xf32, #tpu.memory_space<vmem>>, vector<1x32xf32>
    %4 = vector.broadcast %3 : vector<1x32xf32> to vector<8x32xf32>
    %5 = arith.addf %2, %4 : vector<8x32xf32>
    %cst_5 = arith.constant 0.000000e+00 : f32
    %6 = vector.broadcast %cst_5 : f32 to vector<8x32xf32>
    %7 = arith.maximumf %5, %6 : vector<8x32xf32>
    %c0_6 = arith.constant 0 : index
    %c0_7 = arith.constant 0 : index
    %8 = vector.load %arg4[%c0_6, %c0_7] : memref<32x32xf32, #tpu.memory_space<vmem>>, vector<32x32xf32>
    %cst_8 = arith.constant dense<0.000000e+00> : vector<8x32xf32>
    %9 = tpu.matmul %7, %8, %cst_8 {dimension_numbers = #tpu.dot_dimension_numbers<[1], [0], [0], [1], [0, 0, 1, 1], [], []>} : vector<8x32xf32>, vector<32x32xf32>, vector<8x32xf32> -> vector<8x32xf32>
    %c0_9 = arith.constant 0 : index
    %c0_10 = arith.constant 0 : index
    %10 = vector.load %arg5[%c0_9, %c0_10] : memref<1x32xf32, #tpu.memory_space<vmem>>, vector<1x32xf32>
    %11 = vector.broadcast %10 : vector<1x32xf32> to vector<8x32xf32>
    %12 = arith.addf %9, %11 : vector<8x32xf32>
    %cst_11 = arith.constant 0.000000e+00 : f32
    %13 = vector.broadcast %cst_11 : f32 to vector<8x32xf32>
    %14 = arith.maximumf %12, %13 : vector<8x32xf32>
    %c0_12 = arith.constant 0 : index
    %c0_13 = arith.constant 0 : index
    %15 = vector.load %arg6[%c0_12, %c0_13] : memref<32x128xf32, #tpu.memory_space<vmem>>, vector<32x128xf32>
    %cst_14 = arith.constant dense<0.000000e+00> : vector<8x128xf32>
    %16 = tpu.matmul %14, %15, %cst_14 {dimension_numbers = #tpu.dot_dimension_numbers<[1], [0], [0], [1], [0, 0, 1, 1], [], []>} : vector<8x32xf32>, vector<32x128xf32>, vector<8x128xf32> -> vector<8x128xf32>
    %c0_15 = arith.constant 0 : index
    %c0_16 = arith.constant 0 : index
    %17 = vector.load %arg7[%c0_15, %c0_16] : memref<1x128xf32, #tpu.memory_space<vmem>>, vector<1x128xf32>
    %18 = vector.broadcast %17 : vector<1x128xf32> to vector<8x128xf32>
    %19 = arith.addf %16, %18 : vector<8x128xf32>
    %c0_17 = arith.constant 0 : index
    %c0_18 = arith.constant 0 : index
    %20 = vector.load %arg8[%c0_17, %c0_18] : memref<8x128xf32, #tpu.memory_space<vmem>>, vector<8x128xf32>
    tpu.vector_store %arg8[%c0_17, %c0_18], %19 {strides = array<i32>} : memref<8x128xf32, #tpu.memory_space<vmem>>, vector<8x128xf32>,
    return
  }
  func.func @transform_0(%arg0: i32) -> (i32, i32) {
    %c0_i32 = arith.constant 0 : i32
    %c0_i32_0 = arith.constant 0 : i32
    return %arg0, %c0_i32 : i32, i32
  }
  func.func @transform_1(%arg0: i32) -> (i32, i32) {
    %c0_i32 = arith.constant 0 : i32
    %c0_i32_0 = arith.constant 0 : i32
    %c0_i32_1 = arith.constant 0 : i32
    return %c0_i32, %c0_i32_0 : i32, i32
  }
  func.func @transform_2(%arg0: i32) -> (i32, i32) {
    %c0_i32 = arith.constant 0 : i32
    %c0_i32_0 = arith.constant 0 : i32
    %c0_i32_1 = arith.constant 0 : i32
    return %c0_i32, %c0_i32_0 : i32, i32
  }
  func.func @transform_3(%arg0: i32) -> (i32, i32) {
    %c0_i32 = arith.constant 0 : i32
    %c0_i32_0 = arith.constant 0 : i32
    %c0_i32_1 = arith.constant 0 : i32
    return %c0_i32, %c0_i32_0 : i32, i32
  }
  func.func @transform_4(%arg0: i32) -> (i32, i32) {
    %c0_i32 = arith.constant 0 : i32
    %c0_i32_0 = arith.constant 0 : i32
    %c0_i32_1 = arith.constant 0 : i32
    return %c0_i32, %c0_i32_0 : i32, i32
  }
  func.func @transform_5(%arg0: i32) -> (i32, i32) {
    %c0_i32 = arith.constant 0 : i32
    %c0_i32_0 = arith.constant 0 : i32
    %c0_i32_1 = arith.constant 0 : i32
    return %c0_i32, %c0_i32_0 : i32, i32
  }
  func.func @transform_6(%arg0: i32) -> (i32, i32) {
    %c0_i32 = arith.constant 0 : i32
    %c0_i32_0 = arith.constant 0 : i32
    %c0_i32_1 = arith.constant 0 : i32
    return %c0_i32, %c0_i32_0 : i32, i32
  }
  func.func @transform_7(%arg0: i32) -> (i32, i32) {
    %c0_i32 = arith.constant 0 : i32
    %c0_i32_0 = arith.constant 0 : i32
    return %arg0, %c0_i32 : i32, i32
  }
}

</mosaic_0001>

<bundles_post_ra>
// kernel: tpu_custom_call.1
= control target key start
LH: loop header
LB: loop body
LE: loop exit
PB: predicated region body
PF: predicated region fallthrough
CT: control target
= control target key end

     0   :  { %12 = vsyncpa [#allocation3], 0  ;;  %s416_s0 = inlined_call_operand.hbm [shape: f32[8,16], index: 0, kind: input, shape index: {}]   ;;  %s417_s1 = inlined_call_operand.hbm [shape: f32[16,32], index: 1, kind: input, shape index: {}]   ;;  %s418_s2 = inlined_call_operand.vmem [shape: f32[1,32], index: 2, kind: input, shape index: {}]   ;;  %s419_s3 = inlined_call_operand.hbm [shape: f32[32,32], index: 3, kind: input, shape index: {}]   ;;  %s420_s4 = inlined_call_operand.vmem [shape: f32[1,32], index: 4, kind: input, shape index: {}]   ;;  %s421_s5 = inlined_call_operand.hbm [shape: f32[32,128], index: 5, kind: input, shape index: {}]   ;;  %s422_s6 = inlined_call_operand.vmem [shape: f32[1,128], index: 6, kind: input, shape index: {}]   ;;  %s423_s7 = inlined_call_operand.hbm [shape: f32[8,128], index: 7, kind: output, shape index: {}]  }
   0x1   :  { %13 = vsyncpa [#allocation6], 0 }
   0x2   :  { %14 = vsyncpa [#allocation9], 0  ;;  %s31_s26 = sshll.u32 %s417_s1, 4  ;;  %s32_s26 = int_to_ptr.hbm [resolvable:$true] %s31_s26 }
   0x3   :  { %15 = vsyncpa [#allocation4], 0  ;;  %s345_s27 = smov [#allocation5]   ;;  %s21_s8 = sshll.u32 %s416_s0, 4  ;;  %s22_s8 = int_to_ptr.hbm [resolvable:$true] %s21_s8 }
   0x4   :  { %s33_s28 = sshll.u32 %s345_s27, 4  ;;  %s346_s9 = smov 128   ;;  %s34_s28 = int_to_ptr.vmem [resolvable:$true] %s33_s28 }
   0x5   :  { %s347_s10 = smov 8   ;;  %s348_s11 = smov [#allocation2]  }
   0x6   :  { %39 = dma.hbm_to_vmem [thread:$0]  %s32_s26, 256, %s34_s28, [#allocation6], %s346_s9, %s346_s9, %s347_s10  }
   0x7   :  { %s23_s12 = sshll.u32 %s348_s11, 4  ;;  %s46_s15 = sshll.u32 %s419_s3, 4  ;;  %s24_s12 = int_to_ptr.vmem [resolvable:$true] %s23_s12  ;;  %s47_s15 = int_to_ptr.hbm [resolvable:$true] %s46_s15 }
   0x8   :  { %26 = dma.hbm_to_vmem [thread:$0]  %s22_s8, 128, %s24_s12, [#allocation3]  }
   0x9   :  { %s61_s17 = sshll.u32 %s421_s5, 4  ;;  %s349_s18 = smov [#allocation7]   ;;  %s62_s17 = int_to_ptr.hbm [resolvable:$true] %s61_s17 }
   0xa   :  { %s48_s19 = sshll.u32 %s349_s18, 4  ;;  %s350_s0 = smov [#allocation8]   ;;  %s49_s19 = int_to_ptr.vmem [resolvable:$true] %s48_s19 }
   0xb   :  { %54 = dma.hbm_to_vmem [thread:$0]  %s47_s15, 512, %s49_s19, [#allocation6], %s346_s9, %s346_s9, %s347_s10  }
   0xc   :  { %s63_s20 = sshll.u32 %s350_s0, 4  ;;  %s64_s20 = int_to_ptr.vmem [resolvable:$true] %s63_s20 }
   0xd   :  { %69 = dma.hbm_to_vmem [thread:$0]  %s62_s17, 512, %s64_s20, [#allocation9], %s346_s9, %s346_s9, %s347_s10  }
   0xe   :  { %337 = dma.done.wait [#allocation3], 128  }
   0xf   :  { %338 = vsyncadd [#allocation3], 4294967168 }
  0x10   :  { %339 = dma.done.wait [#allocation6], 768  }
  0x11   :  { %340 = vsyncadd [#allocation6], 4294966528 }
  0x12   :  { %341 = dma.done.wait [#allocation9], 512  }
  0x13   :  { %342 = vsyncadd [#allocation9], 4294966784  ;;  %v90_v0 = vld [vmem:[#allocation5 + $0x8] sm:$0xff]  ;;  %v89_v1 = vld [vmem:[#allocation5] sm:$0xff]  ;;  %vm95_vm0 = vcmask 130048   ;;  %vm128_vm1 = vcmask 261120  }
  0x14   :  { %113 = vmatpush.msra.mxu0 %v90_v0  ;;  %v88_v2 = vld [vmem:[#allocation2] sm:$0xff]  ;;  %v123_v3 = vld [vmem:[#allocation7 + $0x18] sm:$0xff]  ;;  %v122_v4 = vld [vmem:[#allocation7 + $0x10] sm:$0xff]  ;;  %s351_s24 = smov [#allocation10]   ;;  %s192_s28 = sshll.u32 %s423_s7, 4  ;;  %s193_s28 = int_to_ptr.hbm [resolvable:$true] %s192_s28 }
  0x15   :  { %144 = vmatpush.msra.mxu1 %v123_v3  ;;  %v121_v5 = vld [vmem:[#allocation7 + $0x8] sm:$0xff]  ;;  %v120_v6 = vld [vmem:[#allocation7] sm:$0xff]  ;;  %v156_v7 = vld [vmem:[#allocation8 + $0x18] sm:$0xff]  ;;  %s190_s25 = sshll.u32 %s351_s24, 4  ;;  %s191_s25 = int_to_ptr.vmem [resolvable:$true] %s190_s25 }
  0x16   :  { %114 = vmatpush.msra.mxu0 %v89_v1  ;;  %176 = vmatpush.msra.mxu2 %v156_v7  ;;  %v214_v8 = vld [vmem:[%s418_s2] ss:$0 sm:$0xff]  ;;  %v155_v12 = vld [vmem:[#allocation8 + $0x10] sm:$0xff]  ;;  %v153_v14 = vld [vmem:[#allocation8] sm:$0xff] }
  0x17   :  { %204 = vmatmul.msk.f32.vlgmr.msra.gmra.mxu0 %vm95_vm0, %v88_v2  ;;  %145 = vmatpush.msra.mxu1 %v122_v4  ;;  %v154_v13 = vld [vmem:[#allocation8 + $0x8] sm:$0xff] }
  0x18   :  { %177 = vmatpush.msra.mxu2 %v155_v12  ;;  %v215_v15 = vld [vmem:[%s420_s4] ss:$0 sm:$0xff] }
  0x19   :  { %146 = vmatpush.msra.mxu1 %v121_v5  ;;  %v216_v19 = vld [vmem:[%s422_s6] ss:$0 sm:$0xff] }
  0x1a   :  { %178 = vmatpush.msra.mxu2 %v154_v13 }
  0x1b   :  { %147 = vmatpush.msra.mxu1 %v120_v6 }
  0x1c   :  { %179 = vmatpush.msra.mxu2 %v153_v14 }
  0x94   :  { %v116_v9 = vpop.f32.mrf.mxu0 }
  0x95   :  { %v117_v10 = vadd.f32 %v214_v8, %v116_v9 }
  0x97   :  { %v119_v11 = vmax.f32 %v117_v10, 0.0 }
  0x99   :  { %205 = vmatmul.msk.f32.vlgmr.msra.gmra.mxu1 %vm128_vm1, %v119_v11 }
 0x116   :  { %v149_v16 = vpop.f32.mrf.mxu1 }
 0x117   :  { %v150_v17 = vadd.f32 %v215_v15, %v149_v16 }
 0x119   :  { %v152_v18 = vmax.f32 %v150_v17, 0.0 }
 0x11b   :  { %206 = vmatmul.msk.f32.vlgmr.msra.gmra.mxu2 %vm128_vm1, %v152_v18 }
 0x19e   :  { %v181_v20 = vpop.f32.mrf.mxu2 }
 0x19f   :  { %v182_v21 = vadd.f32 %v216_v19, %v181_v20 }
 0x1a1   :  { %184 = vst [vmem:[#allocation10] sm:$0xff] %v182_v21 }
 0x1a2   :  { %195 = dma.vmem_to_hbm [thread:$0]  %s191_s25, 128, %s193_s28, [#allocation4]  }
 0x1a3   :  { %343 = dma.done.wait [#allocation4], 128  }
 0x1a4   :  { %344 = vsyncadd [#allocation4], 4294967168 }
 0x1a5   :  { %200 = vsyncpa [#allocation3], 1 }
 0x1a6   :  { %201 = vsyncpa [#allocation6], 1 }
 0x1a7   :  { %202 = vsyncpa [#allocation9], 1 }
 0x1a8   :  { %203 = vsyncpa [#allocation4], 1 }

</bundles_post_ra>
